<compile_context>
chip_gen: v5e
topology: v5e:2x2
jax: 0.10.0
libtpu: 0.0.40
codegen_flags: <defaults>
</compile_context>

<pallas_src>
import jax
import jax.numpy as jnp
from jax.experimental import pallas as pl
from jax.experimental.pallas import tpu as pltpu


def _round_up(n, m):
    return ((n + m - 1) // m) * m


def mlp3_kernel(x_ref, w1_ref, b1_ref, w2_ref, b2_ref, w3_ref, b3_ref,
                wo_ref, bo_ref, o_ref):
    bf16 = jnp.bfloat16
    # fc1 + ReLU   (bf16 MXU operands, f32 accumulate / elementwise)
    h = jnp.dot(x_ref[...].astype(bf16), w1_ref[...],
                preferred_element_type=jnp.float32) + b1_ref[...]
    h = jnp.maximum(h, 0.0)
    # fc2 + ReLU
    h = jnp.dot(h.astype(bf16), w2_ref[...],
                preferred_element_type=jnp.float32) + b2_ref[...]
    h = jnp.maximum(h, 0.0)
    # fc3 + ReLU
    h = jnp.dot(h.astype(bf16), w3_ref[...],
                preferred_element_type=jnp.float32) + b3_ref[...]
    h = jnp.maximum(h, 0.0)
    # output layer + sigmoid (dist_type == 'jsd' path); lane-dense (TB, 128) store
    out = jnp.dot(h.astype(bf16), wo_ref[...],
                  preferred_element_type=jnp.float32) + bo_ref[...]
    o_ref[...] = jax.nn.sigmoid(out)


def init_params(key, input_size, h1, h2, h3, num_classes=1):
    """f32 params, [in, out] layout (transposed vs PyTorch), nn.Linear-style init."""
    assert h2 == h3, ("MLP3Layer.output has in_features=hidden_size2 but consumes an "
                      "h3-wide activation; module only runs when h2 == h3.")

    def linear(k, fan_in, fan_out):
        kw, kb = jax.random.split(k)
        bound = 1.0 / float(fan_in) ** 0.5
        w = jax.random.uniform(kw, (fan_in, fan_out), jnp.float32, -bound, bound)
        b = jax.random.uniform(kb, (1, fan_out), jnp.float32, -bound, bound)
        return w, b

    k1, k2, k3, k4 = jax.random.split(key, 4)
    w1, b1 = linear(k1, input_size, h1)
    w2, b2 = linear(k2, h1, h2)
    w3, b3 = linear(k3, h2, h3)
    wo, bo = linear(k4, h2, num_classes)   # self.output = nn.Linear(hidden_size2, nc)
    return dict(w1=w1, b1=b1, w2=w2, b2=b2, w3=w3, b3=b3, wo=wo, bo=bo,
                num_classes=num_classes)


def prepare_params(p):
    """Zero-pad every dim to a multiple of 128; weights -> bf16, biases stay f32."""
    def pad_w(w):
        i, o = w.shape
        ip, op = _round_up(i, 128), _round_up(o, 128)
        return jnp.zeros((ip, op), jnp.bfloat16).at[:i, :o].set(w.astype(jnp.bfloat16))

    def pad_b(b):
        o = b.shape[1]
        return jnp.zeros((1, _round_up(o, 128)), jnp.float32).at[:, :o].set(b)

    return dict(
        w1=pad_w(p["w1"]), b1=pad_b(p["b1"]),
        w2=pad_w(p["w2"]), b2=pad_b(p["b2"]),
        w3=pad_w(p["w3"]), b3=pad_b(p["b3"]),
        wo=pad_w(p["wo"]), bo=pad_b(p["bo"]),
        num_classes=p["num_classes"], in_dim=p["w1"].shape[0],
    )


def mlp3_forward(x, prepared, *, tb=None):
    """x: [B, input_size] f32. prepared: output of prepare_params."""
    B, in_dim = x.shape
    assert in_dim == prepared["in_dim"]
    num_classes = prepared["num_classes"]

    IN_P, H1 = prepared["w1"].shape
    H2 = prepared["w2"].shape[1]
    H3 = prepared["w3"].shape[1]
    NCP = prepared["wo"].shape[1]

    # Batch tile: as large as comfortably fits VMEM, multiple of 8 sublanes.
    if tb is None:
        tb = min(512, _round_up(B, 8))
    b_pad = _round_up(B, tb)
    grid = (b_pad // tb,)

    # Zero-pad x on batch (sublane) and feature (lane) axes.
    x_p = jnp.zeros((b_pad, IN_P), jnp.float32).at[:B, :in_dim].set(x)

    def resident(shape):  # weights/biases: same block every step -> stay in VMEM
        return pl.BlockSpec(shape, lambda i: (0, 0))

    flops = 2 * b_pad * (IN_P * H1 + H1 * H2 + H2 * H3 + H3 * NCP)
    bytes_accessed = (
        b_pad * IN_P * 4 + b_pad * NCP * 4                      # x in, out
        + 2 * (IN_P * H1 + H1 * H2 + H2 * H3 + H3 * NCP)        # bf16 weights
        + 4 * (H1 + H2 + H3 + NCP)                              # f32 biases
    )

    out_p = pl.pallas_call(
        mlp3_kernel,
        out_shape=jax.ShapeDtypeStruct((b_pad, NCP), jnp.float32),
        grid=grid,
        in_specs=[
            pl.BlockSpec((tb, IN_P), lambda i: (i, 0)),   # x: streamed batch tiles
            resident((IN_P, H1)), resident((1, H1)),
            resident((H1, H2)),   resident((1, H2)),
            resident((H2, H3)),   resident((1, H3)),
            resident((H3, NCP)),  resident((1, NCP)),
        ],
        out_specs=pl.BlockSpec((tb, NCP), lambda i: (i, 0)),  # lane-dense output slab
        compiler_params=pltpu.CompilerParams(
            dimension_semantics=("parallel",),          # megacore on v7x
            vmem_limit_bytes=64 * 1024 * 1024,          # budget for v7x's 64 MiB VMEM
        ),
        cost_estimate=pl.CostEstimate(
            flops=flops,
            transcendentals=b_pad * NCP,
            bytes_accessed=bytes_accessed,
        ),
    )(x_p, prepared["w1"], prepared["b1"], prepared["w2"], prepared["b2"],
      prepared["w3"], prepared["b3"], prepared["wo"], prepared["bo"])

    return out_p[:B, :num_classes]


def reference_forward(x, p):
    """Pure-f32 reference on the unpadded params (module semantics)."""
    h = jnp.maximum(x @ p["w1"] + p["b1"], 0.0)
    h = jnp.maximum(h @ p["w2"] + p["b2"], 0.0)
    h = jnp.maximum(h @ p["w3"] + p["b3"], 0.0)
    return jax.nn.sigmoid(h @ p["wo"] + p["bo"])


if __name__ == "__main__":
    # Small shapes consistent with the module; h2 == h3 so the original
    # (quirky-but-runnable) forward is well defined.
    B, input_size, h1, h2, h3, num_classes = 8, 16, 32, 32, 32, 1

    key = jax.random.PRNGKey(0)
    k_x, k_p = jax.random.split(key)
    x = jax.random.normal(k_x, (B, input_size), jnp.float32)

    params = init_params(k_p, input_size, h1, h2, h3, num_classes)
    prepared = prepare_params(params)

    out = mlp3_forward(x, prepared)
    out = jax.block_until_ready(out)

    ref = reference_forward(x, params)
    assert out.shape == (B, num_classes)
    # bf16 MXU operands vs pure-f32 reference -> small, bounded deviation.
    assert jnp.allclose(out, ref, atol=2e-2, rtol=2e-2), (
        f"max abs err {jnp.max(jnp.abs(out - ref))}")
    print("KERNEL_OK")
</pallas_src>

<mosaic_0001>
module attributes {stable_mosaic.version = 11 : i64} {
  func.func @mlp3_kernel(%arg0: i32, %arg1: memref<8x128xf32, #tpu.memory_space<vmem>>, %arg2: memref<128x128xbf16, #tpu.memory_space<vmem>>, %arg3: memref<1x128xf32, #tpu.memory_space<vmem>>, %arg4: memref<128x128xbf16, #tpu.memory_space<vmem>>, %arg5: memref<1x128xf32, #tpu.memory_space<vmem>>, %arg6: memref<128x128xbf16, #tpu.memory_space<vmem>>, %arg7: memref<1x128xf32, #tpu.memory_space<vmem>>, %arg8: memref<128x128xbf16, #tpu.memory_space<vmem>>, %arg9: memref<1x128xf32, #tpu.memory_space<vmem>>, %arg10: memref<8x128xf32, #tpu.memory_space<vmem>>) attributes {dimension_semantics = [#tpu.dimension_semantics<parallel>], iteration_bounds = array<i64: 1>, scalar_prefetch = 0 : i64, scratch_operands = 0 : i64, tpu.core_type = #tpu.core_type<tc>, window_params = [{transform_indices = @transform_0, window_bounds = array<i64: 8, 128>}, {pipeline_mode = #tpu.pipeline_mode<synchronous>, transform_indices = @transform_1, window_bounds = array<i64: 128, 128>}, {pipeline_mode = #tpu.pipeline_mode<synchronous>, transform_indices = @transform_2, window_bounds = array<i64: 1, 128>}, {pipeline_mode = #tpu.pipeline_mode<synchronous>, transform_indices = @transform_3, window_bounds = array<i64: 128, 128>}, {pipeline_mode = #tpu.pipeline_mode<synchronous>, transform_indices = @transform_4, window_bounds = array<i64: 1, 128>}, {pipeline_mode = #tpu.pipeline_mode<synchronous>, transform_indices = @transform_5, window_bounds = array<i64: 128, 128>}, {pipeline_mode = #tpu.pipeline_mode<synchronous>, transform_indices = @transform_6, window_bounds = array<i64: 1, 128>}, {pipeline_mode = #tpu.pipeline_mode<synchronous>, transform_indices = @transform_7, window_bounds = array<i64: 128, 128>}, {pipeline_mode = #tpu.pipeline_mode<synchronous>, transform_indices = @transform_8, window_bounds = array<i64: 1, 128>}, {transform_indices = @transform_9, window_bounds = array<i64: 8, 128>}]} {
    %c0 = arith.constant 0 : index
    %c0_0 = arith.constant 0 : index
    %0 = vector.load %arg1[%c0, %c0_0] : memref<8x128xf32, #tpu.memory_space<vmem>>, vector<8x128xf32>
    %1 = arith.truncf %0 : vector<8x128xf32> to vector<8x128xbf16>
    %c0_1 = arith.constant 0 : index
    %c0_2 = arith.constant 0 : index
    %2 = vector.load %arg2[%c0_1, %c0_2] : memref<128x128xbf16, #tpu.memory_space<vmem>>, vector<128x128xbf16>
    %cst = arith.constant dense<0.000000e+00> : vector<8x128xf32>
    %3 = tpu.matmul %1, %2, %cst {dimension_numbers = #tpu.dot_dimension_numbers<[1], [0], [0], [1], [0, 0, 1, 1], [], []>} : vector<8x128xbf16>, vector<128x128xbf16>, vector<8x128xf32> -> vector<8x128xf32>
    %c0_3 = arith.constant 0 : index
    %c0_4 = arith.constant 0 : index
    %4 = vector.load %arg3[%c0_3, %c0_4] : memref<1x128xf32, #tpu.memory_space<vmem>>, vector<1x128xf32>
    %5 = vector.broadcast %4 : vector<1x128xf32> to vector<8x128xf32>
    %6 = arith.addf %3, %5 : vector<8x128xf32>
    %cst_5 = arith.constant 0.000000e+00 : f32
    %7 = vector.broadcast %cst_5 : f32 to vector<8x128xf32>
    %8 = arith.maximumf %6, %7 : vector<8x128xf32>
    %9 = arith.truncf %8 : vector<8x128xf32> to vector<8x128xbf16>
    %c0_6 = arith.constant 0 : index
    %c0_7 = arith.constant 0 : index
    %10 = vector.load %arg4[%c0_6, %c0_7] : memref<128x128xbf16, #tpu.memory_space<vmem>>, vector<128x128xbf16>
    %cst_8 = arith.constant dense<0.000000e+00> : vector<8x128xf32>
    %11 = tpu.matmul %9, %10, %cst_8 {dimension_numbers = #tpu.dot_dimension_numbers<[1], [0], [0], [1], [0, 0, 1, 1], [], []>} : vector<8x128xbf16>, vector<128x128xbf16>, vector<8x128xf32> -> vector<8x128xf32>
    %c0_9 = arith.constant 0 : index
    %c0_10 = arith.constant 0 : index
    %12 = vector.load %arg5[%c0_9, %c0_10] : memref<1x128xf32, #tpu.memory_space<vmem>>, vector<1x128xf32>
    %13 = vector.broadcast %12 : vector<1x128xf32> to vector<8x128xf32>
    %14 = arith.addf %11, %13 : vector<8x128xf32>
    %cst_11 = arith.constant 0.000000e+00 : f32
    %15 = vector.broadcast %cst_11 : f32 to vector<8x128xf32>
    %16 = arith.maximumf %14, %15 : vector<8x128xf32>
    %17 = arith.truncf %16 : vector<8x128xf32> to vector<8x128xbf16>
    %c0_12 = arith.constant 0 : index
    %c0_13 = arith.constant 0 : index
    %18 = vector.load %arg6[%c0_12, %c0_13] : memref<128x128xbf16, #tpu.memory_space<vmem>>, vector<128x128xbf16>
    %cst_14 = arith.constant dense<0.000000e+00> : vector<8x128xf32>
    %19 = tpu.matmul %17, %18, %cst_14 {dimension_numbers = #tpu.dot_dimension_numbers<[1], [0], [0], [1], [0, 0, 1, 1], [], []>} : vector<8x128xbf16>, vector<128x128xbf16>, vector<8x128xf32> -> vector<8x128xf32>
    %c0_15 = arith.constant 0 : index
    %c0_16 = arith.constant 0 : index
    %20 = vector.load %arg7[%c0_15, %c0_16] : memref<1x128xf32, #tpu.memory_space<vmem>>, vector<1x128xf32>
    %21 = vector.broadcast %20 : vector<1x128xf32> to vector<8x128xf32>
    %22 = arith.addf %19, %21 : vector<8x128xf32>
    %cst_17 = arith.constant 0.000000e+00 : f32
    %23 = vector.broadcast %cst_17 : f32 to vector<8x128xf32>
    %24 = arith.maximumf %22, %23 : vector<8x128xf32>
    %25 = arith.truncf %24 : vector<8x128xf32> to vector<8x128xbf16>
    %c0_18 = arith.constant 0 : index
    %c0_19 = arith.constant 0 : index
    %26 = vector.load %arg8[%c0_18, %c0_19] : memref<128x128xbf16, #tpu.memory_space<vmem>>, vector<128x128xbf16>
    %cst_20 = arith.constant dense<0.000000e+00> : vector<8x128xf32>
    %27 = tpu.matmul %25, %26, %cst_20 {dimension_numbers = #tpu.dot_dimension_numbers<[1], [0], [0], [1], [0, 0, 1, 1], [], []>} : vector<8x128xbf16>, vector<128x128xbf16>, vector<8x128xf32> -> vector<8x128xf32>
    %c0_21 = arith.constant 0 : index
    %c0_22 = arith.constant 0 : index
    %28 = vector.load %arg9[%c0_21, %c0_22] : memref<1x128xf32, #tpu.memory_space<vmem>>, vector<1x128xf32>
    %29 = vector.broadcast %28 : vector<1x128xf32> to vector<8x128xf32>
    %30 = arith.addf %27, %29 : vector<8x128xf32>
    %31 = arith.negf %30 : vector<8x128xf32>
    %32 = math.exp %31 : vector<8x128xf32>
    %cst_23 = arith.constant 1.000000e+00 : f32
    %33 = vector.broadcast %cst_23 : f32 to vector<8x128xf32>
    %34 = arith.addf %33, %32 : vector<8x128xf32>
    %35 = arith.divf %33, %34 : vector<8x128xf32>
    %c0_24 = arith.constant 0 : index
    %c0_25 = arith.constant 0 : index
    %36 = vector.load %arg10[%c0_24, %c0_25] : memref<8x128xf32, #tpu.memory_space<vmem>>, vector<8x128xf32>
    tpu.vector_store %arg10[%c0_24, %c0_25], %35 {strides = array<i32>} : memref<8x128xf32, #tpu.memory_space<vmem>>, vector<8x128xf32>,
    return
  }
  func.func @transform_0(%arg0: i32) -> (i32, i32) {
    %c0_i32 = arith.constant 0 : i32
    %c0_i32_0 = arith.constant 0 : i32
    return %arg0, %c0_i32 : i32, i32
  }
  func.func @transform_1(%arg0: i32) -> (i32, i32) {
    %c0_i32 = arith.constant 0 : i32
    %c0_i32_0 = arith.constant 0 : i32
    %c0_i32_1 = arith.constant 0 : i32
    return %c0_i32, %c0_i32_0 : i32, i32
  }
  func.func @transform_2(%arg0: i32) -> (i32, i32) {
    %c0_i32 = arith.constant 0 : i32
    %c0_i32_0 = arith.constant 0 : i32
    %c0_i32_1 = arith.constant 0 : i32
    return %c0_i32, %c0_i32_0 : i32, i32
  }
  func.func @transform_3(%arg0: i32) -> (i32, i32) {
    %c0_i32 = arith.constant 0 : i32
    %c0_i32_0 = arith.constant 0 : i32
    %c0_i32_1 = arith.constant 0 : i32
    return %c0_i32, %c0_i32_0 : i32, i32
  }
  func.func @transform_4(%arg0: i32) -> (i32, i32) {
    %c0_i32 = arith.constant 0 : i32
    %c0_i32_0 = arith.constant 0 : i32
    %c0_i32_1 = arith.constant 0 : i32
    return %c0_i32, %c0_i32_0 : i32, i32
  }
  func.func @transform_5(%arg0: i32) -> (i32, i32) {
    %c0_i32 = arith.constant 0 : i32
    %c0_i32_0 = arith.constant 0 : i32
    %c0_i32_1 = arith.constant 0 : i32
    return %c0_i32, %c0_i32_0 : i32, i32
  }
  func.func @transform_6(%arg0: i32) -> (i32, i32) {
    %c0_i32 = arith.constant 0 : i32
    %c0_i32_0 = arith.constant 0 : i32
    %c0_i32_1 = arith.constant 0 : i32
    return %c0_i32, %c0_i32_0 : i32, i32
  }
  func.func @transform_7(%arg0: i32) -> (i32, i32) {
    %c0_i32 = arith.constant 0 : i32
    %c0_i32_0 = arith.constant 0 : i32
    %c0_i32_1 = arith.constant 0 : i32
    return %c0_i32, %c0_i32_0 : i32, i32
  }
  func.func @transform_8(%arg0: i32) -> (i32, i32) {
    %c0_i32 = arith.constant 0 : i32
    %c0_i32_0 = arith.constant 0 : i32
    %c0_i32_1 = arith.constant 0 : i32
    return %c0_i32, %c0_i32_0 : i32, i32
  }
  func.func @transform_9(%arg0: i32) -> (i32, i32) {
    %c0_i32 = arith.constant 0 : i32
    %c0_i32_0 = arith.constant 0 : i32
    return %arg0, %c0_i32 : i32, i32
  }
}

</mosaic_0001>

<bundles_post_ra>
// kernel: tpu_custom_call.1
= control target key start
LH: loop header
LB: loop body
LE: loop exit
PB: predicated region body
PF: predicated region fallthrough
CT: control target
= control target key end

     0   :  { %14 = vsyncpa [#allocation3], 0  ;;  %s897_s0 = inlined_call_operand.hbm [shape: f32[8,128], index: 0, kind: input, shape index: {}]   ;;  %s898_s1 = inlined_call_operand.hbm [shape: bf16[128,128], index: 1, kind: input, shape index: {}]   ;;  %s899_s2 = inlined_call_operand.vmem [shape: f32[1,128], index: 2, kind: input, shape index: {}]   ;;  %s900_s3 = inlined_call_operand.hbm [shape: bf16[128,128], index: 3, kind: input, shape index: {}]   ;;  %s901_s4 = inlined_call_operand.vmem [shape: f32[1,128], index: 4, kind: input, shape index: {}]   ;;  %s902_s5 = inlined_call_operand.hbm [shape: bf16[128,128], index: 5, kind: input, shape index: {}]   ;;  %s903_s6 = inlined_call_operand.vmem [shape: f32[1,128], index: 6, kind: input, shape index: {}]   ;;  %s904_s7 = inlined_call_operand.hbm [shape: bf16[128,128], index: 7, kind: input, shape index: {}]   ;;  %s905_s8 = inlined_call_operand.vmem [shape: f32[1,128], index: 8, kind: input, shape index: {}]   ;;  %s906_s9 = inlined_call_operand.hbm [shape: f32[8,128], index: 9, kind: output, shape index: {}]  }
   0x1   :  { %15 = vsyncpa [#allocation6], 0 }
   0x2   :  { %16 = vsyncpa [#allocation9], 0  ;;  %s33_s11 = sshll.u32 %s898_s1, 4  ;;  %s34_s11 = int_to_ptr.hbm [resolvable:$true] %s33_s11 }
   0x3   :  { %17 = vsyncpa [#allocation4], 0  ;;  %s809_s12 = smov [#allocation5]   ;;  %s63_s16 = sshll.u32 %s902_s5, 4  ;;  %s64_s16 = int_to_ptr.hbm [resolvable:$true] %s63_s16 }
   0x4   :  { %s35_s13 = sshll.u32 %s809_s12, 4  ;;  %s810_s17 = smov 64   ;;  %s36_s13 = int_to_ptr.vmem [resolvable:$true] %s35_s13 }
   0x5   :  { %s811_s18 = smov 4   ;;  %s812_s19 = smov [#allocation8]  }
   0x6   :  { %41 = dma.hbm_to_vmem [thread:$0]  %s34_s11, 1024, %s36_s13, [#allocation6], %s810_s17, %s810_s17, %s811_s18  }
   0x7   :  { %s65_s20 = sshll.u32 %s812_s19, 4  ;;  %s23_s23 = sshll.u32 %s897_s0, 4  ;;  %s66_s20 = int_to_ptr.vmem [resolvable:$true] %s65_s20  ;;  %s24_s23 = int_to_ptr.hbm [resolvable:$true] %s23_s23 }
   0x8   :  { %71 = dma.hbm_to_vmem [thread:$0]  %s64_s16, 1024, %s66_s20, [#allocation9], %s810_s17, %s810_s17, %s811_s18  }
   0x9   :  { %s48_s25 = sshll.u32 %s900_s3, 4  ;;  %s813_s26 = smov [#allocation2]   ;;  %s49_s25 = int_to_ptr.hbm [resolvable:$true] %s48_s25 }
   0xa   :  { %s25_s27 = sshll.u32 %s813_s26, 4  ;;  %s814_s5 = smov [#allocation7]   ;;  %s26_s27 = int_to_ptr.vmem [resolvable:$true] %s25_s27 }
   0xb   :  { %28 = dma.hbm_to_vmem [thread:$0]  %s24_s23, 128, %s26_s27, [#allocation3]  }
   0xc   :  { %s50_s28 = sshll.u32 %s814_s5, 4  ;;  %s78_s10 = sshll.u32 %s904_s7, 4  ;;  %s51_s28 = int_to_ptr.vmem [resolvable:$true] %s50_s28  ;;  %s79_s10 = int_to_ptr.hbm [resolvable:$true] %s78_s10 }
   0xd   :  { %56 = dma.hbm_to_vmem [thread:$0]  %s49_s25, 1024, %s51_s28, [#allocation6], %s810_s17, %s810_s17, %s811_s18  }
   0xe   :  { %s815_s0 = smov [#allocation10]  }
   0xf   :  { %s80_s11 = sshll.u32 %s815_s0, 4  ;;  %s81_s11 = int_to_ptr.vmem [resolvable:$true] %s80_s11 }
  0x10   :  { %86 = dma.hbm_to_vmem [thread:$0]  %s79_s10, 1024, %s81_s11, [#allocation9], %s810_s17, %s810_s17, %s811_s18  }
  0x11   :  { %801 = dma.done.wait [#allocation3], 128  }
  0x12   :  { %802 = vsyncadd [#allocation3], 4294967168 }
  0x13   :  { %803 = dma.done.wait [#allocation6], 2048  }
  0x14   :  { %804 = vsyncadd [#allocation6], 4294965248 }
  0x15   :  { %805 = dma.done.wait [#allocation9], 2048  }
  0x16   :  { %806 = vsyncadd [#allocation9], 4294965248  ;;  %v616_v0 = vld [vmem:[#allocation5 + $0x38] sm:$0xff]  ;;  %v615_v1 = vld [vmem:[#allocation5 + $0x30] sm:$0xff] }
  0x17   :  { %179 = vmatpush.bf16.msra.mxu0 %v616_v0  ;;  %v624_v2 = vld [vmem:[#allocation7 + $0x38] sm:$0xff]  ;;  %v623_v3 = vld [vmem:[#allocation7 + $0x30] sm:$0xff]  ;;  %v614_v4 = vld [vmem:[#allocation5 + $0x28] sm:$0xff] }
  0x18   :  { %262 = vmatpush.bf16.msra.mxu1 %v624_v2  ;;  %v622_v5 = vld [vmem:[#allocation7 + $0x28] sm:$0xff]  ;;  %v613_v6 = vld [vmem:[#allocation5 + $0x20] sm:$0xff]  ;;  %v612_v8 = vld [vmem:[#allocation5 + $0x18] sm:$0xff] }
  0x19   :  { %v621_v7 = vld [vmem:[#allocation7 + $0x20] sm:$0xff]  ;;  %v620_v9 = vld [vmem:[#allocation7 + $0x18] sm:$0xff]  ;;  %v611_v10 = vld [vmem:[#allocation5 + $0x10] sm:$0xff] }
  0x1a   :  { %v619_v11 = vld [vmem:[#allocation7 + $0x10] sm:$0xff]  ;;  %v610_v12 = vld [vmem:[#allocation5 + $0x8] sm:$0xff]  ;;  %v609_v13 = vld [vmem:[#allocation5] sm:$0xff] }
  0x1b   :  { %180 = vmatpush.bf16.msra.mxu0 %v615_v1  ;;  %v109_v14 = vld [vmem:[#allocation2] sm:$0xff]  ;;  %v618_v16 = vld [vmem:[#allocation7 + $0x8] sm:$0xff]  ;;  %v617_v17 = vld [vmem:[#allocation7] sm:$0xff] }
  0x1c   :  { %263 = vmatpush.bf16.msra.mxu1 %v623_v3  ;;  %v110_v15 = vpack.c.bf16 %v109_v14, %v109_v14  ;;  %v632_v18 = vld [vmem:[#allocation8 + $0x38] sm:$0xff]  ;;  %v631_v19 = vld [vmem:[#allocation8 + $0x30] sm:$0xff]  ;;  %v630_v20 = vld [vmem:[#allocation8 + $0x28] sm:$0xff] }
  0x1d   :  { %345 = vmatpush.bf16.msra.mxu2 %v632_v18  ;;  %v629_v21 = vld [vmem:[#allocation8 + $0x20] sm:$0xff]  ;;  %v628_v22 = vld [vmem:[#allocation8 + $0x18] sm:$0xff]  ;;  %v627_v23 = vld [vmem:[#allocation8 + $0x10] sm:$0xff] }
  0x1e   :  { %v649_v24 = vld [vmem:[%s899_s2] ss:$0 sm:$0xff]  ;;  %v626_v30 = vld [vmem:[#allocation8 + $0x8] sm:$0xff]  ;;  %v625_v31 = vld [vmem:[#allocation8] sm:$0xff] }
  0x1f   :  { %181 = vmatpush.bf16.msra.mxu0 %v614_v4  ;;  %v640_v32 = vld [vmem:[#allocation10 + $0x38] sm:$0xff]  ;;  %v639_v33 = vld [vmem:[#allocation10 + $0x30] sm:$0xff]  ;;  %v638_v34 = vld [vmem:[#allocation10 + $0x28] sm:$0xff] }
  0x20   :  { %264 = vmatpush.bf16.msra.mxu1 %v622_v5  ;;  %428 = vmatpush.bf16.msra.mxu3 %v640_v32  ;;  %v637_v35 = vld [vmem:[#allocation10 + $0x20] sm:$0xff]  ;;  %v636_v36 = vld [vmem:[#allocation10 + $0x18] sm:$0xff]  ;;  %v635_v37 = vld [vmem:[#allocation10 + $0x10] sm:$0xff] }
  0x21   :  { %346 = vmatpush.bf16.msra.mxu2 %v631_v19  ;;  %v650_v38 = vld [vmem:[%s901_s4] ss:$0 sm:$0xff]  ;;  %v634_v44 = vld [vmem:[#allocation10 + $0x8] sm:$0xff]  ;;  %v633_v45 = vld [vmem:[#allocation10] sm:$0xff] }
  0x22   :  { %v651_v46 = vld [vmem:[%s903_s6] ss:$0 sm:$0xff]  ;;  %s816_s6 = smov [#allocation11]  }
  0x23   :  { %182 = vmatpush.bf16.msra.mxu0 %v613_v6  ;;  %v652_v52 = vld [vmem:[%s905_s8] ss:$0 sm:$0xff]  ;;  %s466_s16 = sshll.u32 %s816_s6, 4  ;;  %s468_s8 = sshll.u32 %s906_s9, 4  ;;  %s467_s16 = int_to_ptr.vmem [resolvable:$true] %s466_s16  ;;  %s469_s8 = int_to_ptr.hbm [resolvable:$true] %s468_s8 }
  0x24   :  { %265 = vmatpush.bf16.msra.mxu1 %v621_v7  ;;  %429 = vmatpush.bf16.msra.mxu3 %v639_v33 }
  0x25   :  { %347 = vmatpush.bf16.msra.mxu2 %v630_v20 }
  0x27   :  { %183 = vmatpush.bf16.msra.mxu0 %v612_v8 }
  0x28   :  { %266 = vmatpush.bf16.msra.mxu1 %v620_v9  ;;  %430 = vmatpush.bf16.msra.mxu3 %v638_v34 }
  0x29   :  { %348 = vmatpush.bf16.msra.mxu2 %v629_v21 }
  0x2b   :  { %184 = vmatpush.bf16.msra.mxu0 %v611_v10 }
  0x2c   :  { %267 = vmatpush.bf16.msra.mxu1 %v619_v11  ;;  %431 = vmatpush.bf16.msra.mxu3 %v637_v35 }
  0x2d   :  { %349 = vmatpush.bf16.msra.mxu2 %v628_v22 }
  0x2f   :  { %185 = vmatpush.bf16.msra.mxu0 %v610_v12 }
  0x30   :  { %268 = vmatpush.bf16.msra.mxu1 %v618_v16  ;;  %432 = vmatpush.bf16.msra.mxu3 %v636_v36 }
  0x31   :  { %350 = vmatpush.bf16.msra.mxu2 %v627_v23 }
  0x33   :  { %186 = vmatpush.bf16.msra.mxu0 %v609_v13 }
  0x34   :  { %269 = vmatpush.bf16.msra.mxu1 %v617_v17  ;;  %433 = vmatpush.bf16.msra.mxu3 %v635_v37 }
  0x35   :  { %351 = vmatpush.bf16.msra.mxu2 %v626_v30 }
  0x36   :  { %187 = vmatmul.bf16.vlgmr.msra.gmra.mxu0 %v110_v15 }
  0x38   :  { %434 = vmatpush.bf16.msra.mxu3 %v634_v44 }
  0x39   :  { %352 = vmatpush.bf16.msra.mxu2 %v625_v31 }
  0x3c   :  { %435 = vmatpush.bf16.msra.mxu3 %v633_v45 }
  0xb3   :  { %v188_v25 = vpop.f32.mrf.mxu0 }
  0xb4   :  { %v189_v26 = vadd.f32 %v649_v24, %v188_v25 }
  0xb6   :  { %v192_v27 = vmax.f32 %v189_v26, 0.0 }
  0xb8   :  { %v193_v28 = vpack.c.bf16 %v192_v27, %v192_v27 }
  0xba   :  { %270 = vmatmul.bf16.vlgmr.msra.gmra.mxu1 %v193_v28 }
  0xbb   :  { %v190_v29 = vpop.f32.mrf.mxu0 }
 0x137   :  { %v271_v39 = vpop.f32.mrf.mxu1 }
 0x138   :  { %v272_v40 = vadd.f32 %v650_v38, %v271_v39 }
 0x13a   :  { %v275_v41 = vmax.f32 %v272_v40, 0.0 }
 0x13c   :  { %v276_v42 = vpack.c.bf16 %v275_v41, %v275_v41 }
 0x13e   :  { %353 = vmatmul.bf16.vlgmr.msra.gmra.mxu2 %v276_v42 }
 0x13f   :  { %v273_v43 = vpop.f32.mrf.mxu1 }
 0x1c1   :  { %v354_v47 = vpop.f32.mrf.mxu2 }
 0x1c2   :  { %v355_v48 = vadd.f32 %v651_v46, %v354_v47 }
 0x1c4   :  { %v358_v49 = vmax.f32 %v355_v48, 0.0 }
 0x1c6   :  { %v359_v50 = vpack.c.bf16 %v358_v49, %v358_v49 }
 0x1c8   :  { %436 = vmatmul.bf16.vlgmr.msra.gmra.mxu3 %v359_v50 }
 0x1c9   :  { %v356_v51 = vpop.f32.mrf.mxu2 }
 0x24b   :  { %v437_v53 = vpop.f32.mrf.mxu3 }
 0x24c   :  { %v438_v54 = vadd.f32 %v652_v52, %v437_v53 }
 0x24e   :  { %v608_v55 = vmul.f32 -1.442695, %v438_v54 }
 0x250   :  { %653 = vpow2.f32 %v608_v55 }
 0x253   :  { %v439_v56 = vpop.f32.mrf.mxu3 }
 0x256   :  { %v654_v57 = vpop.eup %653 }
 0x257   :  { %v444_v58 = vadd.f32 1.0, %v654_v57 }
 0x259   :  { %655 = vrcp.f32 %v444_v58  ;;  %v456_v62 = vand.u32 2147483648, %v444_v58  ;;  %v454_v0 = vand.u32 2147483647, %v444_v58  ;;  %vm450_vm1 = vweird.f32 %v444_v58 }
 0x25b   :  { %v457_v2 = vor.u32 1.1754944e-38, %v456_v62  ;;  %vm455_vm3 = vcmp.eq.f32.partialorder %v454_v0, 8.507059e+37 }
 0x25f   :  { %v656_v59 = vpop.eup %655 }
 0x260   :  { %v446_v60 = vmul.f32 %v656_v59, %v444_v58  ;;  %vm451_vm0 = vweird.f32 %v656_v59 }
 0x261   :  { %vm452_vm2 = vmor %vm450_vm1, %vm451_vm0 }
 0x262   :  { %v447_v61 = vsub.f32 1.0, %v446_v60 }
 0x264   :  { %v448_v63 = vmul.f32 %v656_v59, %v447_v61 }
 0x266   :  { %v449_v1 = vadd.f32 %v656_v59, %v448_v63 }
 0x268   :  { %v453_v3 = vsel %vm452_vm2, %v656_v59, %v449_v1 }
 0x269   :  { %v458_v4 = vsel %vm455_vm3, %v457_v2, %v453_v3 }
 0x26a   :  { %460 = vst [vmem:[#allocation11] sm:$0xff] %v458_v4 }
 0x26b   :  { %471 = dma.vmem_to_hbm [thread:$0]  %s467_s16, 128, %s469_s8, [#allocation4]  }
 0x26c   :  { %807 = dma.done.wait [#allocation4], 128  }
 0x26d   :  { %808 = vsyncadd [#allocation4], 4294967168 }
 0x26e   :  { %476 = vsyncpa [#allocation3], 1 }
 0x26f   :  { %477 = vsyncpa [#allocation6], 1 }
 0x270   :  { %478 = vsyncpa [#allocation9], 1 }
 0x271   :  { %479 = vsyncpa [#allocation4], 1 }

</bundles_post_ra>
